<compile_context>
chip_gen: v7x
topology: tpu7x:2x2x1
jax: 0.10.0
libtpu: 0.0.40
codegen_flags: <defaults>
</compile_context>

<pallas_src>
import math

import jax
import jax.numpy as jnp
from jax.experimental import pallas as pl
from jax.experimental.pallas import tpu as pltpu


def _arima011_kernel(drift_ref, theta_ref, err_ref, out_ref):
    # drift_ref / theta_ref: (1,) f32 scalars in SMEM.
    # err_ref / out_ref:     VMEM tiles.
    drift = drift_ref[0]
    theta = theta_ref[0]
    x = err_ref[...].astype(jnp.float32)          # compute in f32, cast on store
    out_ref[...] = (drift + theta * x).astype(out_ref.dtype)


def _round_up(x, m):
    return ((x + m - 1) // m) * m


def _round_down(x, m):
    return (x // m) * m


def _device_config():
    """Returns (target_tile_bytes, vmem_limit_bytes_or_None, num_tensorcores)."""
    kind = ""
    try:
        kind = jax.devices()[0].device_kind.lower()
    except Exception:
        pass
    if "v7" in kind:
        # v7x: 2 TCs, 64 MiB physical VMEM but 32 MiB default scoped limit.
        # 8 MiB tiles (in+out, double buffered ~= 32 MiB) need an explicit limit.
        return 8 << 20, 48 << 20, 2
    if "v6" in kind:
        # 4 MiB tiles -> ~16 MiB resident, within the 32 MiB default scoped VMEM.
        return 4 << 20, None, 1
    # v5e / unknown: 16 MiB default scoped VMEM -> conservative 2 MiB tiles.
    return 2 << 20, None, 1


def _slab_shape(shape, total):
    """Pick a (rows, cols) pure-reshape of the input (never pads/copies)."""
    last = shape[-1] if len(shape) >= 1 else 1
    # Keep the natural trailing dim when it is already lane-friendly; avoids
    # any pad/slice for ragged widths (a block lane dim equal to the full
    # array dim is legal even when it is not a multiple of 128).
    if len(shape) >= 2 and (last % 128 == 0 or last >= 256) and total // last >= 8:
        return total // last, last
    # Otherwise look for a lane-dense power-of-two width that divides exactly,
    # preferring one that also fills all 8 sublanes.
    fallback = None
    for c in (1024, 512, 256, 128):
        if total % c == 0:
            if fallback is None:
                fallback = c
            if total // c >= 8:
                return total // c, c
    if fallback is not None:
        return total // fallback, fallback
    if len(shape) >= 2:
        return total // last, last
    return 1, total


def arima011_forward(drift, theta, err_last, *, donate_err=False):
    """out = drift + theta * err_last, elementwise over err_last."""
    orig_shape = err_last.shape
    dtype = err_last.dtype
    total = math.prod(orig_shape) if orig_shape else 1

    if total == 0:
        return jnp.zeros(orig_shape, dtype)

    drift = jnp.asarray(drift, jnp.float32).reshape(1)
    theta = jnp.asarray(theta, jnp.float32).reshape(1)

    itemsize = jnp.dtype(dtype).itemsize
    target_bytes, vmem_limit, num_cores = _device_config()

    rows, cols = _slab_shape(orig_shape, total)
    x = err_last.reshape(rows, cols)

    if rows > 1:
        # Tile along the sublane (row) axis; the lane dim stays the full slab
        # width so no pad/slice copies are ever needed, even for ragged widths.
        tile_rows = _round_down(max(target_bytes // (cols * itemsize), 8), 8)
        tile_rows = max(tile_rows, 8)
        if tile_rows >= rows:
            tile_rows = rows
        n_tiles = pl.cdiv(rows, tile_rows)
        # Balance short parallel grids across v7x's two TensorCores.
        if num_cores > 1 and 1 < n_tiles <= 8 * num_cores and n_tiles % num_cores:
            n_even = _round_up(n_tiles, num_cores)
            tile_rows = min(rows, max(8, _round_up(pl.cdiv(rows, n_even), 8)))
            n_tiles = pl.cdiv(rows, tile_rows)
        grid = (n_tiles,)
        block = (tile_rows, cols)
        index_map = lambda i: (i, 0)
    else:
        # Rare 1-D / unfactorable corner: tile along the lane axis instead
        # (block lane width is a multiple of 128; tail lanes are masked).
        tile_cols = _round_down(max(target_bytes // itemsize, 128), 128)
        if tile_cols >= cols:
            tile_cols = cols
        grid = (pl.cdiv(cols, tile_cols),)
        block = (1, tile_cols)
        index_map = lambda i: (0, i)

    cp_kwargs = dict(dimension_semantics=("parallel",))
    if vmem_limit is not None:
        cp_kwargs["vmem_limit_bytes"] = vmem_limit
    compiler_params = pltpu.CompilerParams(**cp_kwargs)

    out = pl.pallas_call(
        _arima011_kernel,
        out_shape=jax.ShapeDtypeStruct((rows, cols), dtype),
        grid=grid,
        in_specs=[
            pl.BlockSpec(memory_space=pltpu.SMEM),   # drift
            pl.BlockSpec(memory_space=pltpu.SMEM),   # theta
            pl.BlockSpec(block, index_map),          # err tile
        ],
        out_specs=pl.BlockSpec(block, index_map),
        compiler_params=compiler_params,
        # Only effective when the caller actually donates err_last
        # (jax.jit donate_argnums); otherwise XLA inserts a defensive copy.
        input_output_aliases=({2: 0} if donate_err else {}),
    )(drift, theta, x)

    return out.reshape(orig_shape)


if __name__ == "__main__":
    key = jax.random.PRNGKey(0)
    k_drift, k_theta, k1, k2, k3 = jax.random.split(key, 5)

    # Parameters matching torch.rand(1) init (uniform [0, 1)).
    drift = jax.random.uniform(k_drift, (1,), dtype=jnp.float32)
    theta = jax.random.uniform(k_theta, (1,), dtype=jnp.float32)

    def ref(e):
        return (drift[0] + theta[0] * e.astype(jnp.float32)).astype(e.dtype)

    # 1) Small input consistent with the module (batch=2, channels=4, 16x16):
    #    exercises the rows>=8 lane-dense factorization (8, 256).
    err_small = jax.random.normal(k1, (2, 4, 16, 16), dtype=jnp.float32)
    out_small = jax.block_until_ready(arima011_forward(drift, theta, err_small))
    assert out_small.shape == err_small.shape and out_small.dtype == err_small.dtype
    assert jnp.allclose(out_small, ref(err_small), atol=1e-6, rtol=1e-6)

    # 2) Ragged trailing dim (777): no pad/slice — lane dim is the full 777,
    #    row-tiled grid with a masked partial last block.
    err_rag = jax.random.normal(k2, (4, 600, 777), dtype=jnp.float32)
    out_rag = jax.block_until_ready(arima011_forward(drift, theta, err_rag))
    assert out_rag.shape == err_rag.shape and out_rag.dtype == err_rag.dtype
    assert jnp.allclose(out_rag, ref(err_rag), atol=1e-6, rtol=1e-6)

    # 3) bf16 input: byte-based tile sizing, f32 compute, cast on store.
    err_bf16 = jax.random.normal(k3, (2, 256, 512), dtype=jnp.bfloat16)
    out_bf16 = jax.block_until_ready(arima011_forward(drift, theta, err_bf16))
    assert out_bf16.shape == err_bf16.shape and out_bf16.dtype == err_bf16.dtype
    assert jnp.allclose(out_bf16.astype(jnp.float32),
                        ref(err_bf16).astype(jnp.float32),
                        atol=2e-2, rtol=2e-2)

    print("KERNEL_OK")
</pallas_src>

<mosaic_0001>
module attributes {stable_mosaic.version = 11 : i64} {
  func.func @_arima011_kernel(%arg0: i32, %arg1: memref<1xf32, #tpu.memory_space<smem>>, %arg2: memref<1xf32, #tpu.memory_space<smem>>, %arg3: memref<8x256xf32, #tpu.memory_space<vmem>>, %arg4: memref<8x256xf32, #tpu.memory_space<vmem>>) attributes {dimension_semantics = [#tpu.dimension_semantics<parallel>], iteration_bounds = array<i64: 1>, scalar_prefetch = 0 : i64, scratch_operands = 0 : i64, tpu.core_type = #tpu.core_type<tc>, window_params = [{transform_indices = @transform_0, window_bounds = array<i64: 1>}, {transform_indices = @transform_1, window_bounds = array<i64: 1>}, {transform_indices = @transform_2, window_bounds = array<i64: 8, 256>}, {transform_indices = @transform_3, window_bounds = array<i64: 8, 256>}]} {
    %c0 = arith.constant 0 : index
    %0 = memref.load %arg1[%c0] : memref<1xf32, #tpu.memory_space<smem>>
    %c0_0 = arith.constant 0 : index
    %1 = memref.load %arg2[%c0_0] : memref<1xf32, #tpu.memory_space<smem>>
    %c0_1 = arith.constant 0 : index
    %c0_2 = arith.constant 0 : index
    %2 = vector.load %arg3[%c0_1, %c0_2] : memref<8x256xf32, #tpu.memory_space<vmem>>, vector<8x256xf32>
    %3 = vector.broadcast %1 : f32 to vector<8x256xf32>
    %4 = arith.mulf %3, %2 : vector<8x256xf32>
    %5 = vector.broadcast %0 : f32 to vector<8x256xf32>
    %6 = arith.addf %5, %4 : vector<8x256xf32>
    %c0_3 = arith.constant 0 : index
    %c0_4 = arith.constant 0 : index
    %7 = vector.load %arg4[%c0_3, %c0_4] : memref<8x256xf32, #tpu.memory_space<vmem>>, vector<8x256xf32>
    tpu.vector_store %arg4[%c0_3, %c0_4], %6 {strides = array<i32>} : memref<8x256xf32, #tpu.memory_space<vmem>>, vector<8x256xf32>,
    return
  }
  func.func @transform_0(%arg0: i32) -> i32 {
    %c0_i32 = arith.constant 0 : i32
    %c0_i32_0 = arith.constant 0 : i32
    return %c0_i32 : i32
  }
  func.func @transform_1(%arg0: i32) -> i32 {
    %c0_i32 = arith.constant 0 : i32
    %c0_i32_0 = arith.constant 0 : i32
    return %c0_i32 : i32
  }
  func.func @transform_2(%arg0: i32) -> (i32, i32) {
    %c0_i32 = arith.constant 0 : i32
    %c0_i32_0 = arith.constant 0 : i32
    return %arg0, %c0_i32 : i32, i32
  }
  func.func @transform_3(%arg0: i32) -> (i32, i32) {
    %c0_i32 = arith.constant 0 : i32
    %c0_i32_0 = arith.constant 0 : i32
    return %arg0, %c0_i32 : i32, i32
  }
}

</mosaic_0001>

<bundles_post_ra>
// kernel: tpu_custom_call.1
= control target key start
LH: loop header
LB: loop body
LE: loop exit
PB: predicated region body
PF: predicated region fallthrough
CT: control target
= control target key end

     0   :  { %10 = vsyncpa [#allocation5], 0  ;;  %s158_s0 = inlined_call_operand.<no memory space> [shape: f32[1], index: 0, kind: input, shape index: {}]   ;;  %s159_s1 = inlined_call_operand.<no memory space> [shape: f32[1], index: 1, kind: input, shape index: {}]   ;;  %s160_s2 = inlined_call_operand.hbm [shape: f32[8,256], index: 2, kind: input, shape index: {}]   ;;  %s161_s3 = inlined_call_operand.hbm [shape: f32[8,256], index: 3, kind: output, shape index: {}]  }
   0x1   :  { %11 = vsyncpa [#allocation6], 0  ;;  %s106_s12 = smov [#allocation4]   ;;  %s58_s16 = scalar_lea.hbm %s160_s2, 256 }
   0x2   :  { %s22_s13 = sshll.u32 %s106_s12, 4  ;;  %p59_p0 = scmp.ne.s32.totalorder %s160_s2, %s58_s16  ;;  %s23_s13 = int_to_ptr.vmem [resolvable:$true] %s22_s13 }
   0x3   :  { %p62_p1 = scmp.lt.u32.totalorder %s58_s16, %s160_s2 }
   0x5   :  { %p64_p2 = pnand %p62_p1, %p59_p0 }
   0x7   :  { %67 = shalt.err (!%p64_p2)
}
   0x8   :  { %s68_s21 = scalar_lea.vmem %s23_s13, 256  ;;  %p73_p4 = scmp.lt.s32.totalorder %s23_s13, %s23_s13 }
   0x9   :  { %p69_p3 = scmp.ne.s32.totalorder %s23_s13, %s68_s21  ;;  %p74_p5 = scmp.lt.s32.totalorder %s68_s21, %s68_s21 }
   0xb   :  { %p75_p6 = por %p74_p5, %p73_p4 }
   0xd   :  { %p76_p7 = pnand %p75_p6, %p69_p3 }
   0xf   :  { %79 = shalt.err (!%p76_p7)
}
  0x10   :  { %25 = dma.hbm_to_vmem [thread:$0]  %s160_s2, 256, %s23_s13, [#allocation5]  }
  0x11   :  { %102 = dma.done.wait [#allocation5], 256  }
  0x12   :  { %103 = vsyncadd [#allocation5], 4294967040  ;;  %v33_v0 = vstv %s159_s1  ;;  %v31_v1 = vld [vmem:[#allocation4] sm:$0xff]  ;;  %v36_v2 = vstv %s158_s0  ;;  %v32_v3 = vld [vmem:[#allocation4 + $0x8] sm:$0xff]  ;;  %s107_s28 = smov [#allocation7]  }
  0x13   :  { %s47_s29 = sshll.u32 %s107_s28, 4  ;;  %v34_v4 = vmul.f32 %v33_v0, %v31_v1  ;;  %v35_v5 = vmul.f32 %v33_v0, %v32_v3  ;;  %s48_s29 = int_to_ptr.vmem [resolvable:$true] %s47_s29 }
  0x14   :  { %s80_s2 = scalar_lea.vmem %s48_s29, 256  ;;  %p85_p9 = scmp.lt.s32.totalorder %s48_s29, %s48_s29 }
  0x15   :  { %v37_v6 = vadd.f32 %v36_v2, %v34_v4  ;;  %v38_v7 = vadd.f32 %v36_v2, %v35_v5  ;;  %p81_p8 = scmp.ne.s32.totalorder %s48_s29, %s80_s2  ;;  %p86_p10 = scmp.lt.s32.totalorder %s80_s2, %s80_s2 }
  0x17   :  { %39 = vst [vmem:[#allocation7] sm:$0xff] %v37_v6  ;;  %40 = vst [vmem:[#allocation7 + $0x8] sm:$0xff] %v38_v7  ;;  %p87_p11 = por %p86_p10, %p85_p9 }
  0x19   :  { %p88_p12 = pnand %p87_p11, %p81_p8 }
  0x1b   :  { %91 = shalt.err (!%p88_p12)
}
  0x1c   :  { %s92_s0 = scalar_lea.hbm %s161_s3, 256 }
  0x1d   :  { %p93_p13 = scmp.ne.s32.totalorder %s161_s3, %s92_s0  ;;  %p96_p0 = scmp.lt.u32.totalorder %s92_s0, %s161_s3 }
  0x1f   :  { %p98_p1 = pnand %p96_p0, %p93_p13 }
  0x21   :  { %101 = shalt.err (!%p98_p1)
}
  0x22   :  { %50 = dma.vmem_to_hbm [thread:$0]  %s48_s29, 256, %s161_s3, [#allocation6]  }
  0x23   :  { %104 = dma.done.wait [#allocation6], 256  }
  0x24   :  { %105 = vsyncadd [#allocation6], 4294967040 }
  0x25   :  { %54 = vsyncpa [#allocation5], 1 }
  0x26   :  { %55 = vsyncpa [#allocation6], 1 }

</bundles_post_ra>
